<compile_context>
chip_gen: v6e
topology: v6e:2x2x1
jax: 0.10.0
libtpu: 0.0.40
codegen_flags: <defaults>
</compile_context>

<pallas_src>
import functools

import jax
import jax.numpy as jnp
from jax.experimental import pallas as pl
from jax.experimental.pallas import tpu as pltpu

HIDDEN_DIM = 32
OUTPUT_DIM = 1
HALF = HIDDEN_DIM // 2

_IN_ROWS = 7                     # w_i(3) + w_o(3) + wavelength(1)
_MAX_TILE = 65536                # keeps VMEM well under 48 MiB at f32
_VMEM_LIMIT = 48 * 1024 * 1024   # <= v7x physical 64 MiB; plenty on v5e/v6e


def _silu(x):
    # x * sigmoid(x), written with a single transcendental (tanh) instead of
    # exp + reciprocal: sigmoid(x) == 0.5 * tanh(0.5 * x) + 0.5.
    return x * (0.5 * jnp.tanh(0.5 * x) + 0.5)


def _round_up(x, m):
    return ((x + m - 1) // m) * m


def spectral_decoder_kernel(
    x_ref,        # [7, TN]   rows: w_i(3), w_o(3), wavelength(1)
    wenc_ref,     # [32, 7]   fused vectors+wavelength encoder weights
    benc_ref,     # [32, 1]   fused encoder bias
    wd1_ref,      # [32, 32]  decoder Linear(32,32), (out, in)
    bd1_ref,      # [32, 1]
    wd2_ref,      # [6, 32]   decoder Linear(32,6), (out, in)
    bd2_ref,      # [6, 1]
    wd3_ref,      # [6, 1]    decoder Linear(6,1) weight as a column
    bd3_ref,      # [1, 1]
    out_ref,      # [1, TN]
):
    x = x_ref[...]                                                      # [7, TN]

    # Fused encoders: rows 0..15 = vectors_encoder, rows 16..31 = wavelength
    # encoder.  Result is already the concatenated z = [v ; w].
    z = _silu(jnp.dot(wenc_ref[...], x,
                      preferred_element_type=jnp.float32)
              + benc_ref[...])                                          # [32, TN]

    h = _silu(jnp.dot(wd1_ref[...], z,
                      preferred_element_type=jnp.float32) + bd1_ref[...])   # [32, TN]
    h = _silu(jnp.dot(wd2_ref[...], h,
                      preferred_element_type=jnp.float32) + bd2_ref[...])   # [6, TN]

    # Final Linear(6 -> 1): broadcast multiply + sublane reduce (VPU/XLU),
    # avoiding an MXU round-trip for a K=6, M=1 matmul.
    out_ref[...] = (jnp.sum(wd3_ref[...] * h, axis=0, keepdims=True)
                    + bd3_ref[...])                                     # [1, TN]


def _full_spec(shape):
    # Small weight/bias arrays: whole array resident, same block every step.
    return pl.BlockSpec(shape, lambda i: tuple(0 for _ in shape))


def _choose_tile(n_pad, tile_n):
    """Pick a lane tile: multiple of 128, <= n_pad, >=2 grid steps if possible."""
    tile = min(int(tile_n), _MAX_TILE, n_pad)
    tile = max(128, (tile // 128) * 128)
    if n_pad >= 2 * 128:
        # Keep at least 2 grid steps so both v7x TensorCores get work.
        tile = min(tile, _round_up(-(-n_pad // 2), 128))
    return tile


def _prep_weights(params):
    """Fold the two encoders into one (32,7) matrix + (32,1) bias; transpose
    the decoder weights to (out, in) so all matmuls are W @ X."""
    (w1, b1), (w2, b2), (wd1, bd1), (wd2, bd2), (wd3, bd3) = params
    wenc = jnp.zeros((HIDDEN_DIM, _IN_ROWS), jnp.float32)
    wenc = wenc.at[:HALF, 0:6].set(w1.T)     # vectors_encoder weights (16, 6)
    wenc = wenc.at[HALF:, 6].set(w2[0])      # wavelength_encoder weight (1->16)
    benc = jnp.concatenate([b1[0], b2[0]])[:, None]          # (32, 1)
    return (wenc.astype(jnp.float32), benc.astype(jnp.float32),
            wd1.T.astype(jnp.float32), bd1.T.astype(jnp.float32),   # (32,32),(32,1)
            wd2.T.astype(jnp.float32), bd2.T.astype(jnp.float32),   # (6,32), (6,1)
            wd3.astype(jnp.float32), bd3.T.astype(jnp.float32))     # (6,1),  (1,1)


@functools.partial(jax.jit, static_argnames=("tile_n",))
def spectral_decoder_packed(x_packed, params, *, tile_n=16384):
    """x_packed: channel-major [7, N] f32 (rows: w_i, w_o, wavelength).

    Use this entry point when the producer can emit channel-major data
    directly — it avoids the wrapper-side transpose/concat HBM pass.
    Returns [N, OUTPUT_DIM] f32.
    """
    n = x_packed.shape[1]
    n_pad = _round_up(n, 128)
    tile = _choose_tile(n_pad, tile_n)

    x = x_packed.astype(jnp.float32)
    if n_pad > n:
        x = jnp.pad(x, ((0, 0), (0, n_pad - n)))

    wenc, benc, wd1_t, bd1_c, wd2_t, bd2_c, wd3_c, bd3_c = _prep_weights(params)

    grid = (pl.cdiv(n_pad, tile),)
    in_specs = [
        pl.BlockSpec((_IN_ROWS, tile), lambda i: (0, i)),   # streamed points
        _full_spec(wenc.shape), _full_spec(benc.shape),
        _full_spec(wd1_t.shape), _full_spec(bd1_c.shape),
        _full_spec(wd2_t.shape), _full_spec(bd2_c.shape),
        _full_spec(wd3_c.shape), _full_spec(bd3_c.shape),
    ]
    out_spec = pl.BlockSpec((1, tile), lambda i: (0, i))

    out = pl.pallas_call(
        spectral_decoder_kernel,
        out_shape=jax.ShapeDtypeStruct((1, n_pad), jnp.float32),
        grid_spec=pltpu.PrefetchScalarGridSpec(
            num_scalar_prefetch=0,
            grid=grid,
            in_specs=in_specs,
            out_specs=out_spec,
        ),
        compiler_params=pltpu.CompilerParams(
            dimension_semantics=("parallel",),
            vmem_limit_bytes=_VMEM_LIMIT,
        ),
    )(x, wenc, benc, wd1_t, bd1_c, wd2_t, bd2_c, wd3_c, bd3_c)

    return out[0, :n][:, None]                    # [N, OUTPUT_DIM]


@functools.partial(jax.jit, static_argnames=("tile_n",))
def spectral_decoder(w_i, w_o, wavelength, params, *, tile_n=16384):
    """PyTorch-style API: w_i, w_o: [N, 3]; wavelength: [N] -> [N, OUTPUT_DIM].

    Packs inputs channel-major ([7, N]) before handing off to the kernel.  If
    the producer can emit channel-major data, call spectral_decoder_packed
    directly and skip this repack pass.
    """
    x_packed = jnp.concatenate(
        [w_i.T.astype(jnp.float32),
         w_o.T.astype(jnp.float32),
         wavelength.astype(jnp.float32)[None, :]], axis=0)    # [7, N]
    return spectral_decoder_packed(x_packed, params, tile_n=tile_n)


def init_params(key, hidden_dim=HIDDEN_DIM, output_dim=OUTPUT_DIM):
    """Deterministic synthetic init (PyTorch-default-like uniform fan-in bound).

    Weights stored as (in_features, out_features); biases as (1, out_features).
    """
    half = hidden_dim // 2
    dims = [
        (6, half),                 # vectors_encoder Linear
        (1, half),                 # wavelength_encoder Linear
        (hidden_dim, hidden_dim),  # decoder Linear 0
        (hidden_dim, 6),           # decoder Linear 2
        (6, output_dim),           # decoder Linear 4
    ]
    params = []
    for (fan_in, fan_out) in dims:
        key, kw, kb = jax.random.split(key, 3)
        bound = 1.0 / jnp.sqrt(float(fan_in))
        w = jax.random.uniform(kw, (fan_in, fan_out), jnp.float32, -bound, bound)
        b = jax.random.uniform(kb, (1, fan_out), jnp.float32, -bound, bound)
        params.append((w, b))
    return params


def reference_forward(w_i, w_o, wavelength, params):
    """Pure-JAX reference matching the PyTorch module semantics."""
    def silu(x):
        return x * jax.nn.sigmoid(x)
    (w1, b1), (w2, b2), (wd1, bd1), (wd2, bd2), (wd3, bd3) = params
    x6 = jnp.concatenate([w_i, w_o], axis=-1)
    v = silu(x6 @ w1 + b1)
    w = silu(wavelength[:, None] @ w2 + b2)
    z = jnp.concatenate([v, w], axis=-1)
    z = silu(z @ wd1 + bd1)
    z = silu(z @ wd2 + bd2)
    return z @ wd3 + bd3


if __name__ == "__main__":
    key = jax.random.PRNGKey(0)
    k_params, k_wi, k_wo, k_wl = jax.random.split(key, 4)

    params = init_params(k_params)

    # N deliberately NOT a multiple of 128 and not a multiple of the tile:
    # exercises the 128-pad path AND the ragged last grid block.
    N = 300
    w_i = jax.random.normal(k_wi, (N, 3), jnp.float32)
    w_o = jax.random.normal(k_wo, (N, 3), jnp.float32)
    wavelength = jax.random.uniform(k_wl, (N,), jnp.float32, 0.38, 0.78)

    out = spectral_decoder(w_i, w_o, wavelength, params)
    out = jax.block_until_ready(out)

    ref = reference_forward(w_i, w_o, wavelength, params)
    assert out.shape == (N, OUTPUT_DIM)
    assert jnp.allclose(out, ref, atol=1e-4, rtol=1e-4)

    print("KERNEL_OK")
</pallas_src>

<mosaic_0001>
module attributes {stable_mosaic.version = 11 : i64} {
  func.func @spectral_decoder_kernel(%arg0: i32, %arg1: memref<7x256xf32, #tpu.memory_space<vmem>>, %arg2: memref<32x7xf32, #tpu.memory_space<vmem>>, %arg3: memref<32x1xf32, #tpu.memory_space<vmem>>, %arg4: memref<32x32xf32, #tpu.memory_space<vmem>>, %arg5: memref<32x1xf32, #tpu.memory_space<vmem>>, %arg6: memref<6x32xf32, #tpu.memory_space<vmem>>, %arg7: memref<6x1xf32, #tpu.memory_space<vmem>>, %arg8: memref<6x1xf32, #tpu.memory_space<vmem>>, %arg9: memref<1x1xf32, #tpu.memory_space<vmem>>, %arg10: memref<1x256xf32, #tpu.memory_space<vmem>>) attributes {dimension_semantics = [#tpu.dimension_semantics<parallel>], iteration_bounds = array<i64: 2>, scalar_prefetch = 0 : i64, scratch_operands = 0 : i64, tpu.core_type = #tpu.core_type<tc>, window_params = [{transform_indices = @transform_0, window_bounds = array<i64: 7, 256>}, {pipeline_mode = #tpu.pipeline_mode<synchronous>, transform_indices = @transform_1, window_bounds = array<i64: 32, 7>}, {pipeline_mode = #tpu.pipeline_mode<synchronous>, transform_indices = @transform_2, window_bounds = array<i64: 32, 1>}, {pipeline_mode = #tpu.pipeline_mode<synchronous>, transform_indices = @transform_3, window_bounds = array<i64: 32, 32>}, {pipeline_mode = #tpu.pipeline_mode<synchronous>, transform_indices = @transform_4, window_bounds = array<i64: 32, 1>}, {pipeline_mode = #tpu.pipeline_mode<synchronous>, transform_indices = @transform_5, window_bounds = array<i64: 6, 32>}, {pipeline_mode = #tpu.pipeline_mode<synchronous>, transform_indices = @transform_6, window_bounds = array<i64: 6, 1>}, {pipeline_mode = #tpu.pipeline_mode<synchronous>, transform_indices = @transform_7, window_bounds = array<i64: 6, 1>}, {pipeline_mode = #tpu.pipeline_mode<synchronous>, transform_indices = @transform_8, window_bounds = array<i64: 1, 1>}, {transform_indices = @transform_9, window_bounds = array<i64: 1, 256>}]} {
    %c0 = arith.constant 0 : index
    %c0_0 = arith.constant 0 : index
    %0 = vector.load %arg1[%c0, %c0_0] : memref<7x256xf32, #tpu.memory_space<vmem>>, vector<7x256xf32>
    %c0_1 = arith.constant 0 : index
    %c0_2 = arith.constant 0 : index
    %1 = vector.load %arg2[%c0_1, %c0_2] : memref<32x7xf32, #tpu.memory_space<vmem>>, vector<32x7xf32>
    %cst = arith.constant dense<0.000000e+00> : vector<32x256xf32>
    %2 = tpu.matmul %1, %0, %cst {dimension_numbers = #tpu.dot_dimension_numbers<[1], [0], [0], [1], [0, 0, 1, 1], [], []>} : vector<32x7xf32>, vector<7x256xf32>, vector<32x256xf32> -> vector<32x256xf32>
    %c0_3 = arith.constant 0 : index
    %c0_4 = arith.constant 0 : index
    %3 = vector.load %arg3[%c0_3, %c0_4] : memref<32x1xf32, #tpu.memory_space<vmem>>, vector<32x1xf32>
    %4 = vector.broadcast %3 : vector<32x1xf32> to vector<32x256xf32>
    %5 = arith.addf %2, %4 : vector<32x256xf32>
    %cst_5 = arith.constant 5.000000e-01 : f32
    %6 = vector.broadcast %cst_5 : f32 to vector<32x256xf32>
    %7 = arith.mulf %6, %5 : vector<32x256xf32>
    %8 = math.tanh %7 : vector<32x256xf32>
    %cst_6 = arith.constant 5.000000e-01 : f32
    %9 = vector.broadcast %cst_6 : f32 to vector<32x256xf32>
    %10 = arith.mulf %9, %8 : vector<32x256xf32>
    %cst_7 = arith.constant 5.000000e-01 : f32
    %11 = vector.broadcast %cst_7 : f32 to vector<32x256xf32>
    %12 = arith.addf %10, %11 : vector<32x256xf32>
    %13 = arith.mulf %5, %12 : vector<32x256xf32>
    %c0_8 = arith.constant 0 : index
    %c0_9 = arith.constant 0 : index
    %14 = vector.load %arg4[%c0_8, %c0_9] : memref<32x32xf32, #tpu.memory_space<vmem>>, vector<32x32xf32>
    %cst_10 = arith.constant dense<0.000000e+00> : vector<32x256xf32>
    %15 = tpu.matmul %14, %13, %cst_10 {dimension_numbers = #tpu.dot_dimension_numbers<[1], [0], [0], [1], [0, 0, 1, 1], [], []>} : vector<32x32xf32>, vector<32x256xf32>, vector<32x256xf32> -> vector<32x256xf32>
    %c0_11 = arith.constant 0 : index
    %c0_12 = arith.constant 0 : index
    %16 = vector.load %arg5[%c0_11, %c0_12] : memref<32x1xf32, #tpu.memory_space<vmem>>, vector<32x1xf32>
    %17 = vector.broadcast %16 : vector<32x1xf32> to vector<32x256xf32>
    %18 = arith.addf %15, %17 : vector<32x256xf32>
    %cst_13 = arith.constant 5.000000e-01 : f32
    %19 = vector.broadcast %cst_13 : f32 to vector<32x256xf32>
    %20 = arith.mulf %19, %18 : vector<32x256xf32>
    %21 = math.tanh %20 : vector<32x256xf32>
    %cst_14 = arith.constant 5.000000e-01 : f32
    %22 = vector.broadcast %cst_14 : f32 to vector<32x256xf32>
    %23 = arith.mulf %22, %21 : vector<32x256xf32>
    %cst_15 = arith.constant 5.000000e-01 : f32
    %24 = vector.broadcast %cst_15 : f32 to vector<32x256xf32>
    %25 = arith.addf %23, %24 : vector<32x256xf32>
    %26 = arith.mulf %18, %25 : vector<32x256xf32>
    %c0_16 = arith.constant 0 : index
    %c0_17 = arith.constant 0 : index
    %27 = vector.load %arg6[%c0_16, %c0_17] : memref<6x32xf32, #tpu.memory_space<vmem>>, vector<6x32xf32>
    %cst_18 = arith.constant dense<0.000000e+00> : vector<6x256xf32>
    %28 = tpu.matmul %27, %26, %cst_18 {dimension_numbers = #tpu.dot_dimension_numbers<[1], [0], [0], [1], [0, 0, 1, 1], [], []>} : vector<6x32xf32>, vector<32x256xf32>, vector<6x256xf32> -> vector<6x256xf32>
    %c0_19 = arith.constant 0 : index
    %c0_20 = arith.constant 0 : index
    %29 = vector.load %arg7[%c0_19, %c0_20] : memref<6x1xf32, #tpu.memory_space<vmem>>, vector<6x1xf32>
    %30 = vector.broadcast %29 : vector<6x1xf32> to vector<6x256xf32>
    %31 = arith.addf %28, %30 : vector<6x256xf32>
    %cst_21 = arith.constant 5.000000e-01 : f32
    %32 = vector.broadcast %cst_21 : f32 to vector<6x256xf32>
    %33 = arith.mulf %32, %31 : vector<6x256xf32>
    %34 = math.tanh %33 : vector<6x256xf32>
    %cst_22 = arith.constant 5.000000e-01 : f32
    %35 = vector.broadcast %cst_22 : f32 to vector<6x256xf32>
    %36 = arith.mulf %35, %34 : vector<6x256xf32>
    %cst_23 = arith.constant 5.000000e-01 : f32
    %37 = vector.broadcast %cst_23 : f32 to vector<6x256xf32>
    %38 = arith.addf %36, %37 : vector<6x256xf32>
    %39 = arith.mulf %31, %38 : vector<6x256xf32>
    %c0_24 = arith.constant 0 : index
    %c0_25 = arith.constant 0 : index
    %40 = vector.load %arg8[%c0_24, %c0_25] : memref<6x1xf32, #tpu.memory_space<vmem>>, vector<6x1xf32>
    %41 = vector.broadcast %40 : vector<6x1xf32> to vector<6x256xf32>
    %42 = arith.mulf %41, %39 : vector<6x256xf32>
    %cst_26 = arith.constant dense<0.000000e+00> : vector<256xf32>
    %43 = vector.multi_reduction <add>, %42, %cst_26 [0] : vector<6x256xf32> to vector<256xf32>
    %44 = vector.shape_cast %43 : vector<256xf32> to vector<1x256xf32>
    %c0_27 = arith.constant 0 : index
    %c0_28 = arith.constant 0 : index
    %45 = vector.load %arg9[%c0_27, %c0_28] : memref<1x1xf32, #tpu.memory_space<vmem>>, vector<1x1xf32>
    %46 = vector.broadcast %45 : vector<1x1xf32> to vector<1x256xf32>
    %47 = arith.addf %44, %46 : vector<1x256xf32>
    %c0_29 = arith.constant 0 : index
    %c0_30 = arith.constant 0 : index
    %48 = vector.load %arg10[%c0_29, %c0_30] : memref<1x256xf32, #tpu.memory_space<vmem>>, vector<1x256xf32>
    tpu.vector_store %arg10[%c0_29, %c0_30], %47 {strides = array<i32>} : memref<1x256xf32, #tpu.memory_space<vmem>>, vector<1x256xf32>,
    return
  }
  func.func @transform_0(%arg0: i32) -> (i32, i32) {
    %c0_i32 = arith.constant 0 : i32
    %c0_i32_0 = arith.constant 0 : i32
    return %c0_i32, %arg0 : i32, i32
  }
  func.func @transform_1(%arg0: i32) -> (i32, i32) {
    %c0_i32 = arith.constant 0 : i32
    %c0_i32_0 = arith.constant 0 : i32
    %c0_i32_1 = arith.constant 0 : i32
    return %c0_i32, %c0_i32_0 : i32, i32
  }
  func.func @transform_2(%arg0: i32) -> (i32, i32) {
    %c0_i32 = arith.constant 0 : i32
    %c0_i32_0 = arith.constant 0 : i32
    %c0_i32_1 = arith.constant 0 : i32
    return %c0_i32, %c0_i32_0 : i32, i32
  }
  func.func @transform_3(%arg0: i32) -> (i32, i32) {
    %c0_i32 = arith.constant 0 : i32
    %c0_i32_0 = arith.constant 0 : i32
    %c0_i32_1 = arith.constant 0 : i32
    return %c0_i32, %c0_i32_0 : i32, i32
  }
  func.func @transform_4(%arg0: i32) -> (i32, i32) {
    %c0_i32 = arith.constant 0 : i32
    %c0_i32_0 = arith.constant 0 : i32
    %c0_i32_1 = arith.constant 0 : i32
    return %c0_i32, %c0_i32_0 : i32, i32
  }
  func.func @transform_5(%arg0: i32) -> (i32, i32) {
    %c0_i32 = arith.constant 0 : i32
    %c0_i32_0 = arith.constant 0 : i32
    %c0_i32_1 = arith.constant 0 : i32
    return %c0_i32, %c0_i32_0 : i32, i32
  }
  func.func @transform_6(%arg0: i32) -> (i32, i32) {
    %c0_i32 = arith.constant 0 : i32
    %c0_i32_0 = arith.constant 0 : i32
    %c0_i32_1 = arith.constant 0 : i32
    return %c0_i32, %c0_i32_0 : i32, i32
  }
  func.func @transform_7(%arg0: i32) -> (i32, i32) {
    %c0_i32 = arith.constant 0 : i32
    %c0_i32_0 = arith.constant 0 : i32
    %c0_i32_1 = arith.constant 0 : i32
    return %c0_i32, %c0_i32_0 : i32, i32
  }
  func.func @transform_8(%arg0: i32) -> (i32, i32) {
    %c0_i32 = arith.constant 0 : i32
    %c0_i32_0 = arith.constant 0 : i32
    %c0_i32_1 = arith.constant 0 : i32
    return %c0_i32, %c0_i32_0 : i32, i32
  }
  func.func @transform_9(%arg0: i32) -> (i32, i32) {
    %c0_i32 = arith.constant 0 : i32
    %c0_i32_0 = arith.constant 0 : i32
    return %c0_i32, %arg0 : i32, i32
  }
}

</mosaic_0001>

<bundles_post_ra>
// kernel: spectral_decoder_packed.1
= control target key start
LH: loop header
LB: loop body
LE: loop exit
PB: predicated region body
PF: predicated region fallthrough
CT: control target
= control target key end

     0   :  { %s2402_s0 = inlined_call_operand.vmem [shape: f32[7,384], index: 0, kind: input, shape index: {}]   ;;  %s2403_s1 = inlined_call_operand.vmem [shape: f32[32,7], index: 1, kind: input, shape index: {}]   ;;  %s2404_s2 = inlined_call_operand.vmem [shape: f32[32,1], index: 2, kind: input, shape index: {}]   ;;  %s2405_s3 = inlined_call_operand.vmem [shape: f32[32,32], index: 3, kind: input, shape index: {}]   ;;  %s2406_s4 = inlined_call_operand.vmem [shape: f32[32,1], index: 4, kind: input, shape index: {}]   ;;  %s2407_s5 = inlined_call_operand.vmem [shape: f32[6,32], index: 5, kind: input, shape index: {}]   ;;  %s2408_s6 = inlined_call_operand.vmem [shape: f32[6,1], index: 6, kind: input, shape index: {}]   ;;  %s2409_s7 = inlined_call_operand.vmem [shape: f32[6,1], index: 7, kind: input, shape index: {}]   ;;  %s2410_s8 = inlined_call_operand.<no memory space> [shape: f32[1,1], index: 8, kind: input, shape index: {}]   ;;  %s2411_s9 = inlined_call_operand.vmem [shape: f32[1,384], index: 9, kind: output, shape index: {}]  }
   0x1   :  { %v14_v0 = vstv %s2410_s8 }
   0x2   :  { %15 = vst [vmem:[#allocation2] sm:$0x1] %v14_v0 }
   0x3   :  { %s1859_s11 = smov 0   ;;  %s1861_s12 = smov 0  }
   0x4   :  { %s1863_s13 = smov 0  }
   0x5 LB: > { %s1402_s8 = sadd.s32 4294967295, %s1735_s13   ;;  %s1872_s14 = sadd.s32 1, %s1735_s13   ;;  %s1735_s13 = sphi %s1863_s13, %s2427_s13   ;;  %s1731_s12 = sphi %s1861_s12, %s2426_s12   ;;  %s1727_s11 = sphi %s1859_s11, %s2425_s11  }
   0x6   : > { %s219_s15 = ssub.s32 %s1735_s13, %s1872_s14  ;;  %s222_s16 = sadd.s32 1, %s1731_s12 }
   0x7   : > { %p220_p0 = scmp.eq.s32.totalorder %s219_s15, 0  ;;  %p232_p1 = scmp.ne.s32.totalorder %s1731_s12, %s1727_s11 }
   0x8   : > { %p233_p2 = scmp.eq.s32.totalorder %s1402_s8, 1  ;;  %p1406_p3 = scmp.ge.s32.totalorder %s1735_s13, 1 }
   0x9   : > { %s1879_s17 = scalar_select %p220_p0, %s1731_s12, %s222_s16  }
   0xa   : > { %p1881_p4 = por %p233_p2, %p232_p1  ;;  %p298_p5 = scmp.lt.s32.totalorder %s1735_s13, 3 }
   0xc   : > { %p299_p6 = pnand %p1406_p3, %p298_p5 }
   0xd   : > { %s1885_s19 = sshll.u32 (!%p299_p6), %s1402_s8, 1  ;;  %s334_s10 = sand.u32 (!%p299_p6), 1, %s1727_s11  }
   0xe   : > { %302 = sbr.rel (%p299_p6) target bundleno = 894 (0x37e), region = 56  ;;  %p342_p7 = scmp.lt.s32.totalorder (!%p299_p6), %s1885_s19, 2 }
  0x13   : > { %v1801_v1 = vmov 0.0   ;;  %v365_v2 = vld [vmem:[%s2404_s2 + $0x18] sm:$0xff]  ;;  %v1802_v3 = vmov 0   ;;  %v363_v4 = vld [vmem:[%s2404_s2 + $0x8] sm:$0xff]  ;;  %s343_s24 = scalar_select %p342_p7, %s1885_s19, 2  ;;  %v364_v5 = vld [vmem:[%s2404_s2 + $0x10] sm:$0xff] }
  0x14   : > { %470 = vmatprep.mubr.f32.mxu0 %v1801_v1  ;;  %640 = vmatprep.mubr.f32.mxu1 %v1801_v1  ;;  %v362_v6 = vld [vmem:[%s2404_s2] sm:$0xff]  ;;  %vm399_vm0 = vcmask 1046528   ;;  %vm386_vm1 = vcmask 56320   ;;  %v542_v10 = vld [vmem:[%s2406_s4 + $0x18] sm:$0xff]  ;;  %v541_v11 = vld [vmem:[%s2406_s4 + $0x10] sm:$0xff]  ;;  %vm563_vm2 = vcmask 261120   ;;  %s1986_s20 = scalar_lea.vmem (%p1881_p4), %s2411_s9, %s1885_s19  }
  0x15   : > { %1611 = vset.pattern.permute.xlu0 %v1802_v3  ;;  %1612 = vset.pattern.permute.xlu1 %v1802_v3  ;;  %s1409_s29 = sshll.u32 %s343_s24, 3  ;;  %v358_v9 = vld [vmem:[%s2403_s1] sm:$0xff]  ;;  %v359_v12 = vld [vmem:[%s2403_s1 + $0x8] sm:$0xff]  ;;  %v360_v15 = vld [vmem:[%s2403_s1 + $0x10] sm:$0xff]  ;;  %vm804_vm3 = vcmask 1045504   ;;  %s862_s15 = ssub.s32 (%p1881_p4), 3, %s1885_s19 }
  0x16   : > { %383 = vperm.xlu0 %1611, %v365_v2   ;;  %373 = vperm.xlu1 %1612, %v363_v4   ;;  %s345_s13 = scalar_lea.vmem %s2402_s0, %s1409_s29  ;;  %v540_v13 = vld [vmem:[%s2406_s4 + $0x8] sm:$0xff]  ;;  %v539_v14 = vld [vmem:[%s2406_s4] sm:$0xff]  ;;  %v361_v18 = vld [vmem:[%s2403_s1 + $0x18] sm:$0xff]  ;;  %p863_p8 = scmp.lt.s32.totalorder (%p1881_p4), %s862_s15, 2 }
  0x17   : > { %v357_v7 = vld [vmem:[%s345_s13 + $0x8] sm:$0x7f]  ;;  %v356_v8 = vld [vmem:[%s345_s13] sm:$0x7f]  ;;  %s1407_s13 = sshll.u32 %s334_s10, 1 }
  0x18   : > { %1410 = vmatprep.subr.msk.mxu0 %vm399_vm0, %v357_v7  ;;  %v706_v16 = vld [vmem:[%s2408_s6] sm:$0x3f]  ;;  %s1976_s8 = scalar_lea.vmem [#allocation3], %s1407_s13  }
  0x19   : > { %1411 = vmatpush1.msk.msra.mxu0 %vm399_vm0, %v356_v8  ;;  %v796_v17 = vld [vmem:[%s2409_s7] sm:$0x3f] }
  0x1a   : > { %378 = vperm.xlu0 %1611, %v364_v5   ;;  %368 = vperm.xlu1 %1612, %v362_v6   ;;  %v819_v19 = vld [vmem:[#allocation2] sm:$0x1] }
  0x1b   : > { %1412 = vmatmul.mubr.msk.f32.vlgmr.msra.gmra.mxu0 %vm386_vm1, %v358_v9 }
  0x1c   : > { %476 = vmatprep.mubr.f32.mxu0 %v1801_v1 }
  0x1e   : > { %560 = vperm.xlu0 %1611, %v542_v10   ;;  %555 = vperm.xlu1 %1612, %v541_v11  }
  0x1f   : > { %1413 = vmatmul.mubr.msk.f32.gmra.mxu0 %vm386_vm1, %v359_v12 }
  0x20   : > { %482 = vmatprep.mubr.f32.mxu0 %v1801_v1 }
  0x22   : > { %550 = vperm.xlu0 %1611, %v540_v13   ;;  %545 = vperm.xlu1 %1612, %v539_v14  }
  0x23   : > { %1414 = vmatmul.mubr.msk.f32.gmra.mxu0 %vm386_vm1, %v360_v15 }
  0x24   : > { %488 = vmatprep.mubr.f32.mxu0 %v1801_v1 }
  0x26   : > { %709 = vperm.xlu0 %1611, %v706_v16   ;;  %799 = vperm.xlu1 %1612, %v796_v17   ;;  %v535_v17 = vld [vmem:[%s2405_s3] sm:$0xff] }
  0x27   : > { %1415 = vmatmul.mubr.msk.f32.gmra.mxu0 %vm386_vm1, %v361_v18  ;;  %v536_v18 = vld [vmem:[%s2405_s3 + $0x8] sm:$0xff] }
  0x28   : > { %779 = vmatprep.mubr.f32.mxu0 %v1801_v1 }
  0x2a   : > { %822 = vperm.xlu0 %1611, %v819_v19   ;;  %v537_v19 = vld [vmem:[%s2405_s3 + $0x10] sm:$0xff] }
  0x91   : > { %v374_v20 = vpop.permute.xlu1 %373  ;;  %v384_v22 = vpop.permute.xlu0 %383 }
  0x95   : > { %v369_v24 = vpop.permute.xlu1 %368  ;;  %v379_v29 = vpop.permute.xlu0 %378 }
  0xdb   : > { %v472_v21 = vpop.f32.mrf.mxu0 }
  0xdc   : > { %v473_v37 = vadd.f32 %v472_v21, %v369_v24  ;;  %v556_v21 = vpop.permute.xlu1 %555 }
  0xdd   : > { %v474_v23 = vpop.f32.mrf.mxu0 }
  0xde   : > { %v1944_v26 = vadd.f32 %v474_v23, %v369_v24  ;;  %v495_v46 = vmul.f32 0.5, %v473_v37 }
  0xdf   : > { %v478_v25 = vpop.f32.mrf.mxu0 }
  0xe0   : > { %v496_v31 = vmul.f32 0.5, %v1944_v26  ;;  %v479_v33 = vadd.f32 %v478_v25, %v374_v20  ;;  %v546_v25 = vpop.permute.xlu1 %545 }
  0xe1   : > { %v480_v27 = vpop.f32.mrf.mxu0 }
  0xe2   : > { %v481_v28 = vadd.f32 %v480_v27, %v374_v20  ;;  %1613 = vtanh.f32 %v496_v31  ;;  %v497_v42 = vmul.f32 0.5, %v479_v33  ;;  %v538_v20 = vld [vmem:[%s2405_s3 + $0x18] sm:$0xff] }
  0xe3   : > { %v484_v30 = vpop.f32.mrf.mxu0 }
  0xe4   : > { %v485_v32 = vadd.f32 %v484_v30, %v379_v29  ;;  %v498_v34 = vmul.f32 0.5, %v481_v28 }
  0xe5   : > { %v486_v35 = vpop.f32.mrf.mxu0 }
  0xe6   : > { %v487_v36 = vadd.f32 %v486_v35, %v379_v29  ;;  %v499_v38 = vmul.f32 0.5, %v485_v32  ;;  %1615 = vtanh.f32 %v498_v34 }
  0xe7   : > { %v490_v39 = vpop.f32.mrf.mxu0 }
  0xe8   : > { %v500_v40 = vmul.f32 0.5, %v487_v36  ;;  %v491_v41 = vadd.f32 %v490_v39, %v384_v22 }
  0xe9   : > { %v492_v43 = vpop.f32.mrf.mxu0 }
  0xea   : > { %1617 = vtanh.f32 %v500_v40  ;;  %v501_v44 = vmul.f32 0.5, %v491_v41  ;;  %v493_v45 = vadd.f32 %v492_v43, %v384_v22  ;;  %v561_v22 = vpop.permute.xlu0 %560 }
  0xeb   : > { %1619 = vtanh.f32 %v499_v38 }
  0xec   : > { %1621 = vtanh.f32 %v501_v44  ;;  %v502_v47 = vmul.f32 0.5, %v493_v45 }
  0xed   : > { %1623 = vtanh.f32 %v497_v42 }
  0xee   : > { %1625 = vtanh.f32 %v502_v47 }
  0xef   : > { %1627 = vtanh.f32 %v495_v46  ;;  %v1614_v48 = vpop.eup %1613 }
  0xf0   : > { %v512_v63 = vmul.f32 0.5, %v1614_v48 }
  0xf2   : > { %v520_v9 = vadd.f32 0.5, %v512_v63 }
  0xf3   : > { %v1616_v49 = vpop.eup %1615 }
  0xf4   : > { %v514_v59 = vmul.f32 0.5, %v1616_v49  ;;  %v528_v15 = vmul.f32 %v520_v9, %v1944_v26 }
  0xf6   : > { %v522_v5 = vadd.f32 0.5, %v514_v59 }
  0xf7   : > { %v1618_v50 = vpop.eup %1617 }
  0xf8   : > { %v1620_v51 = vpop.eup %1619  ;;  %v516_v54 = vmul.f32 0.5, %v1618_v50  ;;  %v530_v13 = vmul.f32 %v522_v5, %v481_v28  ;;  %v551_v28 = vpop.permute.xlu0 %550 }
  0xf9   : > { %v1622_v52 = vpop.eup %1621  ;;  %v515_v57 = vmul.f32 0.5, %v1620_v51 }
  0xfa   : > { %v1624_v53 = vpop.eup %1623  ;;  %v517_v55 = vmul.f32 0.5, %v1622_v52  ;;  %v524_v0 = vadd.f32 0.5, %v516_v54 }
  0xfb   : > { %v1626_v56 = vpop.eup %1625  ;;  %v513_v61 = vmul.f32 0.5, %v1624_v53  ;;  %v523_v4 = vadd.f32 0.5, %v515_v57 }
  0xfc   : > { %v1628_v58 = vpop.eup %1627  ;;  %v518_v60 = vmul.f32 0.5, %v1626_v56  ;;  %v525_v62 = vadd.f32 0.5, %v517_v55  ;;  %v532_v10 = vmul.f32 %v524_v0, %v487_v36 }
  0xfd   : > { %v511_v3 = vmul.f32 0.5, %v1628_v58  ;;  %v521_v7 = vadd.f32 0.5, %v513_v61  ;;  %v531_v12 = vmul.f32 %v523_v4, %v485_v32 }
  0xfe   : > { %v526_v2 = vadd.f32 0.5, %v518_v60  ;;  %v533_v8 = vmul.f32 %v525_v62, %v491_v41 }
  0xff   : > { %v519_v11 = vadd.f32 0.5, %v511_v3  ;;  %v529_v14 = vmul.f32 %v521_v7, %v479_v33 }
 0x100   : > { %v534_v6 = vmul.f32 %v526_v2, %v493_v45 }
 0x101   : > { %v527_v16 = vmul.f32 %v519_v11, %v473_v37 }
 0x102   : > { %600 = vmatprep.subr.mxu1 %v534_v6 }
 0x103   : > { %601 = vmatpush1.msra.mxu1 %v533_v8 }
 0x104   : > { %602 = vmatprep.subr.mxu1 %v532_v10 }
 0x105   : > { %603 = vmatpush1.msra.mxu1 %v531_v12 }
 0x106   : > { %604 = vmatprep.subr.mxu1 %v530_v13 }
 0x107   : > { %605 = vmatpush1.msra.mxu1 %v529_v14 }
 0x108   : > { %606 = vmatprep.subr.mxu1 %v528_v15 }
 0x109   : > { %607 = vmatpush1.msra.mxu1 %v527_v16 }
 0x10a   : > { %1416 = vmatmul.mubr.msk.f32.vlgmr.msra.gmra.mxu1 %vm563_vm2, %v535_v17  ;;  %v705_v17 = vld [vmem:[%s2407_s5] sm:$0x3f] }
 0x10b   : > { %646 = vmatprep.mubr.f32.mxu1 %v1801_v1 }
 0x10e   : > { %1417 = vmatmul.mubr.msk.f32.gmra.mxu1 %vm563_vm2, %v536_v18  ;;  %v710_v18 = vpop.permute.xlu0 %709 }
 0x10f   : > { %652 = vmatprep.mubr.f32.mxu1 %v1801_v1 }
 0x112   : > { %1418 = vmatmul.mubr.msk.f32.gmra.mxu1 %vm563_vm2, %v537_v19 }
 0x113   : > { %658 = vmatprep.mubr.f32.mxu1 %v1801_v1 }
 0x116   : > { %1419 = vmatmul.mubr.msk.f32.gmra.mxu1 %vm563_vm2, %v538_v20 }
 0x1ca   : > { %v642_v23 = vpop.f32.mrf.mxu1 }
 0x1cb   : > { %v643_v37 = vadd.f32 %v642_v23, %v546_v25 }
 0x1cc   : > { %v644_v24 = vpop.f32.mrf.mxu1 }
 0x1cd   : > { %v1967_v27 = vadd.f32 %v644_v24, %v546_v25  ;;  %v665_v46 = vmul.f32 0.5, %v643_v37 }
 0x1ce   : > { %v648_v26 = vpop.f32.mrf.mxu1 }
 0x1cf   : > { %v666_v1 = vmul.f32 0.5, %v1967_v27  ;;  %v649_v33 = vadd.f32 %v648_v26, %v551_v28 }
 0x1d0   : > { %v650_v29 = vpop.f32.mrf.mxu1 }
 0x1d1   : > { %v651_v30 = vadd.f32 %v650_v29, %v551_v28  ;;  %1629 = vtanh.f32 %v666_v1  ;;  %v667_v42 = vmul.f32 0.5, %v649_v33  ;;  %v800_v1 = vpop.permute.xlu1 %799 }
 0x1d2   : > { %v654_v31 = vpop.f32.mrf.mxu1 }
 0x1d3   : > { %v655_v32 = vadd.f32 %v654_v31, %v556_v21  ;;  %v668_v34 = vmul.f32 0.5, %v651_v30 }
 0x1d4   : > { %v656_v35 = vpop.f32.mrf.mxu1 }
 0x1d5   : > { %v657_v36 = vadd.f32 %v656_v35, %v556_v21  ;;  %v669_v38 = vmul.f32 0.5, %v655_v32  ;;  %1631 = vtanh.f32 %v668_v34 }
 0x1d6   : > { %v660_v39 = vpop.f32.mrf.mxu1 }
 0x1d7   : > { %v670_v40 = vmul.f32 0.5, %v657_v36  ;;  %v661_v41 = vadd.f32 %v660_v39, %v561_v22 }
 0x1d8   : > { %v662_v43 = vpop.f32.mrf.mxu1 }
 0x1d9   : > { %1633 = vtanh.f32 %v670_v40  ;;  %v671_v44 = vmul.f32 0.5, %v661_v41  ;;  %v663_v45 = vadd.f32 %v662_v43, %v561_v22 }
 0x1da   : > { %1635 = vtanh.f32 %v669_v38 }
 0x1db   : > { %1637 = vtanh.f32 %v671_v44  ;;  %v672_v47 = vmul.f32 0.5, %v663_v45  ;;  %v1803_v44 = vmov 1966171168  }
 0x1dc   : > { %1639 = vtanh.f32 %v667_v42 }
 0x1dd   : > { %1641 = vtanh.f32 %v672_v47 }
 0x1de   : > { %1643 = vtanh.f32 %v665_v46  ;;  %v1630_v48 = vpop.eup %1629 }
 0x1df   : > { %v682_v63 = vmul.f32 0.5, %v1630_v48 }
 0x1e1   : > { %v690_v9 = vadd.f32 0.5, %v682_v63 }
 0x1e2   : > { %v1632_v49 = vpop.eup %1631 }
 0x1e3   : > { %v684_v59 = vmul.f32 0.5, %v1632_v49  ;;  %v698_v15 = vmul.f32 %v690_v9, %v1967_v27 }
 0x1e5   : > { %v692_v5 = vadd.f32 0.5, %v684_v59 }
 0x1e6   : > { %v1634_v50 = vpop.eup %1633 }
 0x1e7   : > { %v1636_v51 = vpop.eup %1635  ;;  %v686_v54 = vmul.f32 0.5, %v1634_v50  ;;  %v700_v13 = vmul.f32 %v692_v5, %v651_v30 }
 0x1e8   : > { %v1638_v52 = vpop.eup %1637  ;;  %v685_v57 = vmul.f32 0.5, %v1636_v51  ;;  %v823_v51 = vpop.permute.xlu0 %822 }
 0x1e9   : > { %v1640_v53 = vpop.eup %1639  ;;  %v687_v55 = vmul.f32 0.5, %v1638_v52  ;;  %v694_v0 = vadd.f32 0.5, %v686_v54 }
 0x1ea   : > { %v1642_v56 = vpop.eup %1641  ;;  %v683_v61 = vmul.f32 0.5, %v1640_v53  ;;  %v693_v4 = vadd.f32 0.5, %v685_v57 }
 0x1eb   : > { %v1644_v58 = vpop.eup %1643  ;;  %v688_v60 = vmul.f32 0.5, %v1642_v56  ;;  %v695_v62 = vadd.f32 0.5, %v687_v55  ;;  %v702_v10 = vmul.f32 %v694_v0, %v657_v36  ;;  %v825_v36 = vlaneseq }
 0x1ec   : > { %v681_v3 = vmul.f32 0.5, %v1644_v58  ;;  %v691_v7 = vadd.f32 0.5, %v683_v61  ;;  %v701_v12 = vmul.f32 %v693_v4, %v655_v32 }
 0x1ed   : > { %v696_v2 = vadd.f32 0.5, %v688_v60  ;;  %v703_v8 = vmul.f32 %v695_v62, %v661_v41  ;;  %v826_v41 = vshrl.u32 %v825_v36, 7  ;;  %vm851_vm4 = vcmp.lt.s32.totalorder %v825_v36, 256 }
 0x1ee   : > { %v689_v11 = vadd.f32 0.5, %v681_v3  ;;  %v699_v14 = vmul.f32 %v691_v7, %v649_v33 }
 0x1ef   : > { %v704_v6 = vmul.f32 %v696_v2, %v663_v45  ;;  %v835_v45 = vunpack.c.l.s4 %v1803_v44  ;;  %v827_v48 = vsub.s32 0, %v826_v41 }
 0x1f0   : > { %v697_v16 = vmul.f32 %v689_v11, %v643_v37 }
 0x1f1   : > { %739 = vmatprep.subr.mxu0 %v704_v6  ;;  %v836_v52 = vunpack.c.0.s8 %v835_v45  ;;  %v828_v55 = vrot.slane %v823_v51, %v827_v48 }
 0x1f2   : > { %740 = vmatpush1.msra.mxu0 %v703_v8 }
 0x1f3   : > { %741 = vmatprep.subr.mxu0 %v702_v10  ;;  %v839_v57 = vsub.s32 %v836_v52, %v826_v41 }
 0x1f4   : > { %742 = vmatpush1.msra.mxu0 %v701_v12 }
 0x1f5   : > { %743 = vmatprep.subr.mxu0 %v700_v13 }
 0x1f6   : > { %744 = vmatpush1.msra.mxu0 %v699_v14 }
 0x1f7   : > { %745 = vmatprep.subr.mxu0 %v698_v15 }
 0x1f8   : > { %746 = vmatpush1.msra.mxu0 %v697_v16 }
 0x1f9   : > { %1420 = vmatmul.mubr.msk.f32.vlgmr.msra.gmra.mxu0 %vm563_vm2, %v705_v17 }
 0x2b9   : > { %v781_v19 = vpop.f32.mrf.mxu0 }
 0x2ba   : > { %v782_v20 = vadd.f32 %v781_v19, %v710_v18 }
 0x2bb   : > { %v783_v21 = vpop.f32.mrf.mxu0 }
 0x2bc   : > { %v786_v22 = vmul.f32 0.5, %v782_v20  ;;  %v784_v23 = vadd.f32 %v783_v21, %v710_v18 }
 0x2be   : > { %1645 = vtanh.f32 %v786_v22  ;;  %v787_v24 = vmul.f32 0.5, %v784_v23 }
 0x2c0   : > { %1647 = vtanh.f32 %v787_v24 }
 0x2cb   : > { %v1646_v25 = vpop.eup %1645 }
 0x2cc   : > { %v790_v26 = vmul.f32 0.5, %v1646_v25 }
 0x2cd   : > { %v1648_v27 = vpop.eup %1647 }
 0x2ce   : > { %v792_v28 = vadd.f32 0.5, %v790_v26  ;;  %v791_v29 = vmul.f32 0.5, %v1648_v27 }
 0x2d0   : > { %v794_v30 = vmul.f32 %v792_v28, %v782_v20  ;;  %v793_v31 = vadd.f32 0.5, %v791_v29 }
 0x2d2   : > { %v802_v32 = vmul.f32 %v800_v1, %v794_v30  ;;  %v795_v33 = vmul.f32 %v793_v31, %v784_v23 }
 0x2d4   : > { %v805_v34 = vsel %vm804_vm3, %v802_v32, 0.0  ;;  %v803_v35 = vmul.f32 %v800_v1, %v795_v33 }
 0x2d5   : > { %v806_v37 = vrot.slane %v805_v34, 4 }
 0x2d6   : > { %v812_v38 = vsel %vm804_vm3, %v803_v35, 0.0 }
 0x2d7   : > { %v807_v39 = vadd.f32 %v806_v37, %v805_v34  ;;  %v813_v40 = vrot.slane %v812_v38, 4 }
 0x2d9   : > { %v808_v42 = vrot.slane %v807_v39, 2  ;;  %v814_v43 = vadd.f32 %v813_v40, %v812_v38 }
 0x2db   : > { %v809_v46 = vadd.f32 %v808_v42, %v807_v39  ;;  %v815_v47 = vrot.slane %v814_v43, 2 }
 0x2dd   : > { %v810_v49 = vrot.slane %v809_v46, 1  ;;  %v816_v50 = vadd.f32 %v815_v47, %v814_v43 }
 0x2df   : > { %v811_v53 = vadd.f32 %v810_v49, %v809_v46  ;;  %v817_v54 = vrot.slane %v816_v50, 1 }
 0x2e1   : > { %v818_v56 = vadd.f32 %v817_v54, %v816_v50  ;;  %v829_v58 = vadd.f32 %v828_v55, %v811_v53 }
 0x2e3   : > { %v830_v59 = vadd.f32 %v828_v55, %v818_v56 }
 0x2e5   : > { %v833_v60 = vcombine.low %v829_v58, %v830_v59 }
 0x2e7   : > { %v840_v61 = vrot.slane %v833_v60, %v839_v57  ;;  %860 = sbr.rel (!%p1881_p4) target bundleno = 894 (0x37e), region = 60 }
 0x2e9   : > { %v847_v62 = vrot.slane %v840_v61, %v839_v57 }
 0x2eb   : > { %853 = vst.msk [vmem:[%s1976_s8] sm:$0x3] %vm851_vm4, %v847_v62 }
 0x2ec   : > { %s2429_s15 = smov (!%p863_p8, %s862_s15), 2 }
 0x2ed   : > { %s1423_s21 = sshll.u32 %s2429_s15, 4 }
 0x2ee   : > { %p1425_p9 = scmp.eq.s32.totalorder %s1423_s21, 0 }
 0x2ef   : > { %p871_p10 = scmp.lt.u32.totalorder (!%p1425_p9), %s2429_s15, 8 }
 0x2f0   : > { %870 = sbr.rel (%p1425_p9) target bundleno = 894 (0x37e), region = 64 }
 0x2f5   : > { %874 = sbr.rel (%p871_p10) target bundleno = 885 (0x375), region = 68  ;;  %s1993_s18 = sand.u32 (!%p871_p10), 7, %s2429_s15  }
 0x2f6   : > { %p891_p11 = scmp.eq.s32.totalorder (!%p871_p10), %s1993_s18, 0  ;;  %p1426_p12 = scmp.ne.s32.totalorder (!%p871_p10), %s1993_s18, 0 }
 0x2fa   : > { %894 = sbr.rel (%p1426_p12) target bundleno = 821 (0x335), region = 83  ;;  %s895_s19 = sshrl.u32 (!%p1426_p12), %s2429_s15, 3 }
 0x2fb   : > { %s2000_s22 = sshrl.u32 (!%p1426_p12), %s895_s19, 6 }
 0x2fc   : > { %p1427_p13 = scmp.le.s32.totalorder (!%p1426_p12), %s2000_s22, 0 }
 0x2ff   : > { %1331 = sbr.rel (%p1427_p13) target bundleno = 805 (0x325), region = 164  ;;  %s2413_s23 = smov (!%p1427_p13), %s1986_s20 }
 0x300   : > { %s2414_s24 = smov (!%p1427_p13), %s1976_s8  ;;  %s2009_s25 = smov (!%p1427_p13), 0  }
 0x301   : > { %s2011_s26 = smov (!%p1427_p13), 0  }
 0x304 LB: >> { %v908_v63 = vld [vmem:[%s1743_s24] sm:$0xff]  ;;  %v910_v0 = vld [vmem:[%s1743_s24 + $0x8] sm:$0xff]  ;;  %v912_v2 = vld [vmem:[%s1743_s24 + $0x10] sm:$0xff]  ;;  %s1036_s27 = sadd.s32 1, %s1747_s25  ;;  %s902_s26 = sadd.s32 1, %s1751_s26   ;;  %s1751_s26 = sphi %s2011_s26, %s902_s26   ;;  %s1747_s25 = sphi %s2009_s25, %s2417_s25   ;;  %s1743_s24 = sphi %s2414_s24, %s2416_s24   ;;  %s1739_s23 = sphi %s2413_s23, %s2415_s23  }
 0x305   : >> { %909 = vst [vmem:[%s1739_s23] sm:$0xff] %v908_v63  ;;  %911 = vst [vmem:[%s1739_s23 + $0x8] sm:$0xff] %v910_v0  ;;  %v914_v3 = vld [vmem:[%s1743_s24 + $0x18] sm:$0xff]  ;;  %v916_v4 = vld [vmem:[%s1743_s24 + $0x20] sm:$0xff]  ;;  %p1037_p0 = scmp.ge.s32.totalorder %s1036_s27, %s2000_s22  ;;  %p901_p1 = scmp.ge.s32.totalorder %s902_s26, %s2000_s22 }
 0x306   : >> { %913 = vst [vmem:[%s1739_s23 + $0x10] sm:$0xff] %v912_v2  ;;  %v918_v5 = vld [vmem:[%s1743_s24 + $0x28] sm:$0xff]  ;;  %915 = vst [vmem:[%s1739_s23 + $0x18] sm:$0xff] %v914_v3  ;;  %v920_v6 = vld [vmem:[%s1743_s24 + $0x30] sm:$0xff] }
 0x307   : >> { %917 = vst [vmem:[%s1739_s23 + $0x20] sm:$0xff] %v916_v4  ;;  %919 = vst [vmem:[%s1739_s23 + $0x28] sm:$0xff] %v918_v5  ;;  %v922_v7 = vld [vmem:[%s1743_s24 + $0x38] sm:$0xff]  ;;  %v924_v8 = vld [vmem:[%s1743_s24 + $0x40] sm:$0xff]  ;;  %s2431_s27 = smov (%p1037_p0, %s1036_s27), 0 }
 0x308   : >> { %921 = vst [vmem:[%s1739_s23 + $0x30] sm:$0xff] %v920_v6  ;;  %923 = vst [vmem:[%s1739_s23 + $0x38] sm:$0xff] %v922_v7  ;;  %v926_v9 = vld [vmem:[%s1743_s24 + $0x48] sm:$0xff]  ;;  %v928_v10 = vld [vmem:[%s1743_s24 + $0x50] sm:$0xff]  ;;  %s1428_s28 = sshll.u32 %s2431_s27, 9  ;;  %s2417_s25 = smov %s2431_s27 }
 0x309   : >> { %925 = vst [vmem:[%s1739_s23 + $0x40] sm:$0xff] %v924_v8  ;;  %v930_v11 = vld [vmem:[%s1743_s24 + $0x58] sm:$0xff]  ;;  %927 = vst [vmem:[%s1739_s23 + $0x48] sm:$0xff] %v926_v9  ;;  %v932_v12 = vld [vmem:[%s1743_s24 + $0x60] sm:$0xff]  ;;  %s2067_s29 = scalar_lea.vmem %s1976_s8, %s1428_s28 [#allocation3]   ;;  %s2070_s30 = scalar_lea.vmem %s1986_s20, %s1428_s28  }
 0x30a   : >> { %929 = vst [vmem:[%s1739_s23 + $0x50] sm:$0xff] %v928_v10  ;;  %931 = vst [vmem:[%s1739_s23 + $0x58] sm:$0xff] %v930_v11  ;;  %v934_v13 = vld [vmem:[%s1743_s24 + $0x68] sm:$0xff]  ;;  %v936_v14 = vld [vmem:[%s1743_s24 + $0x70] sm:$0xff] }
 0x30b   : >> { %933 = vst [vmem:[%s1739_s23 + $0x60] sm:$0xff] %v932_v12  ;;  %935 = vst [vmem:[%s1739_s23 + $0x68] sm:$0xff] %v934_v13  ;;  %v938_v15 = vld [vmem:[%s1743_s24 + $0x78] sm:$0xff]  ;;  %v940_v16 = vld [vmem:[%s1743_s24 + $0x80] sm:$0xff] }
 0x30c   : >> { %937 = vst [vmem:[%s1739_s23 + $0x70] sm:$0xff] %v936_v14  ;;  %v942_v17 = vld [vmem:[%s1743_s24 + $0x88] sm:$0xff]  ;;  %939 = vst [vmem:[%s1739_s23 + $0x78] sm:$0xff] %v938_v15  ;;  %v944_v18 = vld [vmem:[%s1743_s24 + $0x90] sm:$0xff] }
 0x30d   : >> { %941 = vst [vmem:[%s1739_s23 + $0x80] sm:$0xff] %v940_v16  ;;  %943 = vst [vmem:[%s1739_s23 + $0x88] sm:$0xff] %v942_v17  ;;  %v946_v19 = vld [vmem:[%s1743_s24 + $0x98] sm:$0xff]  ;;  %v948_v20 = vld [vmem:[%s1743_s24 + $0xa0] sm:$0xff] }
 0x30e   : >> { %945 = vst [vmem:[%s1739_s23 + $0x90] sm:$0xff] %v944_v18  ;;  %947 = vst [vmem:[%s1739_s23 + $0x98] sm:$0xff] %v946_v19  ;;  %v950_v21 = vld [vmem:[%s1743_s24 + $0xa8] sm:$0xff]  ;;  %v952_v22 = vld [vmem:[%s1743_s24 + $0xb0] sm:$0xff] }
 0x30f   : >> { %949 = vst [vmem:[%s1739_s23 + $0xa0] sm:$0xff] %v948_v20  ;;  %v954_v23 = vld [vmem:[%s1743_s24 + $0xb8] sm:$0xff]  ;;  %951 = vst [vmem:[%s1739_s23 + $0xa8] sm:$0xff] %v950_v21  ;;  %v956_v24 = vld [vmem:[%s1743_s24 + $0xc0] sm:$0xff] }
 0x310   : >> { %953 = vst [vmem:[%s1739_s23 + $0xb0] sm:$0xff] %v952_v22  ;;  %955 = vst [vmem:[%s1739_s23 + $0xb8] sm:$0xff] %v954_v23  ;;  %v958_v25 = vld [vmem:[%s1743_s24 + $0xc8] sm:$0xff]  ;;  %v960_v26 = vld [vmem:[%s1743_s24 + $0xd0] sm:$0xff] }
 0x311   : >> { %957 = vst [vmem:[%s1739_s23 + $0xc0] sm:$0xff] %v956_v24  ;;  %959 = vst [vmem:[%s1739_s23 + $0xc8] sm:$0xff] %v958_v25  ;;  %v962_v27 = vld [vmem:[%s1743_s24 + $0xd8] sm:$0xff]  ;;  %v964_v28 = vld [vmem:[%s1743_s24 + $0xe0] sm:$0xff] }
 0x312   : >> { %961 = vst [vmem:[%s1739_s23 + $0xd0] sm:$0xff] %v960_v26  ;;  %v966_v29 = vld [vmem:[%s1743_s24 + $0xe8] sm:$0xff]  ;;  %963 = vst [vmem:[%s1739_s23 + $0xd8] sm:$0xff] %v962_v27  ;;  %v968_v30 = vld [vmem:[%s1743_s24 + $0xf0] sm:$0xff] }
 0x313   : >> { %965 = vst [vmem:[%s1739_s23 + $0xe0] sm:$0xff] %v964_v28  ;;  %967 = vst [vmem:[%s1739_s23 + $0xe8] sm:$0xff] %v966_v29  ;;  %v970_v31 = vld [vmem:[%s1743_s24 + $0xf8] sm:$0xff]  ;;  %v972_v1 = vld [vmem:[%s1743_s24 + $0x100] sm:$0xff] }
 0x314   : >> { %969 = vst [vmem:[%s1739_s23 + $0xf0] sm:$0xff] %v968_v30  ;;  %971 = vst [vmem:[%s1739_s23 + $0xf8] sm:$0xff] %v970_v31  ;;  %v974_v32 = vld [vmem:[%s1743_s24 + $0x108] sm:$0xff]  ;;  %v976_v33 = vld [vmem:[%s1743_s24 + $0x110] sm:$0xff] }
 0x315   : >> { %973 = vst [vmem:[%s1739_s23 + $0x100] sm:$0xff] %v972_v1  ;;  %v978_v34 = vld [vmem:[%s1743_s24 + $0x118] sm:$0xff]  ;;  %975 = vst [vmem:[%s1739_s23 + $0x108] sm:$0xff] %v974_v32  ;;  %v980_v35 = vld [vmem:[%s1743_s24 + $0x120] sm:$0xff] }
 0x316   : >> { %977 = vst [vmem:[%s1739_s23 + $0x110] sm:$0xff] %v976_v33  ;;  %979 = vst [vmem:[%s1739_s23 + $0x118] sm:$0xff] %v978_v34  ;;  %v982_v36 = vld [vmem:[%s1743_s24 + $0x128] sm:$0xff]  ;;  %v984_v37 = vld [vmem:[%s1743_s24 + $0x130] sm:$0xff] }
 0x317   : >> { %981 = vst [vmem:[%s1739_s23 + $0x120] sm:$0xff] %v980_v35  ;;  %983 = vst [vmem:[%s1739_s23 + $0x128] sm:$0xff] %v982_v36  ;;  %v986_v38 = vld [vmem:[%s1743_s24 + $0x138] sm:$0xff]  ;;  %v988_v39 = vld [vmem:[%s1743_s24 + $0x140] sm:$0xff] }
 0x318   : >> { %985 = vst [vmem:[%s1739_s23 + $0x130] sm:$0xff] %v984_v37  ;;  %v990_v40 = vld [vmem:[%s1743_s24 + $0x148] sm:$0xff]  ;;  %987 = vst [vmem:[%s1739_s23 + $0x138] sm:$0xff] %v986_v38  ;;  %v992_v41 = vld [vmem:[%s1743_s24 + $0x150] sm:$0xff] }
 0x319   : >> { %989 = vst [vmem:[%s1739_s23 + $0x140] sm:$0xff] %v988_v39  ;;  %991 = vst [vmem:[%s1739_s23 + $0x148] sm:$0xff] %v990_v40  ;;  %v994_v42 = vld [vmem:[%s1743_s24 + $0x158] sm:$0xff]  ;;  %v996_v43 = vld [vmem:[%s1743_s24 + $0x160] sm:$0xff] }
 0x31a   : >> { %993 = vst [vmem:[%s1739_s23 + $0x150] sm:$0xff] %v992_v41  ;;  %995 = vst [vmem:[%s1739_s23 + $0x158] sm:$0xff] %v994_v42  ;;  %v998_v44 = vld [vmem:[%s1743_s24 + $0x168] sm:$0xff]  ;;  %v1000_v45 = vld [vmem:[%s1743_s24 + $0x170] sm:$0xff] }
 0x31b   : >> { %997 = vst [vmem:[%s1739_s23 + $0x160] sm:$0xff] %v996_v43  ;;  %v1002_v46 = vld [vmem:[%s1743_s24 + $0x178] sm:$0xff]  ;;  %999 = vst [vmem:[%s1739_s23 + $0x168] sm:$0xff] %v998_v44  ;;  %v1004_v47 = vld [vmem:[%s1743_s24 + $0x180] sm:$0xff] }
 0x31c   : >> { %1001 = vst [vmem:[%s1739_s23 + $0x170] sm:$0xff] %v1000_v45  ;;  %1003 = vst [vmem:[%s1739_s23 + $0x178] sm:$0xff] %v1002_v46  ;;  %v1006_v48 = vld [vmem:[%s1743_s24 + $0x188] sm:$0xff]  ;;  %v1008_v49 = vld [vmem:[%s1743_s24 + $0x190] sm:$0xff] }
 0x31d   : >> { %1005 = vst [vmem:[%s1739_s23 + $0x180] sm:$0xff] %v1004_v47  ;;  %1007 = vst [vmem:[%s1739_s23 + $0x188] sm:$0xff] %v1006_v48  ;;  %v1010_v50 = vld [vmem:[%s1743_s24 + $0x198] sm:$0xff]  ;;  %v1012_v51 = vld [vmem:[%s1743_s24 + $0x1a0] sm:$0xff] }
 0x31e   : >> { %1009 = vst [vmem:[%s1739_s23 + $0x190] sm:$0xff] %v1008_v49  ;;  %v1014_v52 = vld [vmem:[%s1743_s24 + $0x1a8] sm:$0xff]  ;;  %1011 = vst [vmem:[%s1739_s23 + $0x198] sm:$0xff] %v1010_v50  ;;  %v1016_v53 = vld [vmem:[%s1743_s24 + $0x1b0] sm:$0xff] }
 0x31f   : >> { %1013 = vst [vmem:[%s1739_s23 + $0x1a0] sm:$0xff] %v1012_v51  ;;  %1015 = vst [vmem:[%s1739_s23 + $0x1a8] sm:$0xff] %v1014_v52  ;;  %v1018_v54 = vld [vmem:[%s1743_s24 + $0x1b8] sm:$0xff]  ;;  %v1020_v55 = vld [vmem:[%s1743_s24 + $0x1c0] sm:$0xff] }
 0x320   : >> { %1017 = vst [vmem:[%s1739_s23 + $0x1b0] sm:$0xff] %v1016_v53  ;;  %1019 = vst [vmem:[%s1739_s23 + $0x1b8] sm:$0xff] %v1018_v54  ;;  %v1022_v56 = vld [vmem:[%s1743_s24 + $0x1c8] sm:$0xff]  ;;  %v1024_v57 = vld [vmem:[%s1743_s24 + $0x1d0] sm:$0xff]  ;;  %904 = sbr.rel (!%p901_p1) target bundleno = 772 (0x304), region = 170 }
 0x321   : >> { %1021 = vst [vmem:[%s1739_s23 + $0x1c0] sm:$0xff] %v1020_v55  ;;  %v1026_v58 = vld [vmem:[%s1743_s24 + $0x1d8] sm:$0xff]  ;;  %1023 = vst [vmem:[%s1739_s23 + $0x1c8] sm:$0xff] %v1022_v56  ;;  %v1028_v59 = vld [vmem:[%s1743_s24 + $0x1e0] sm:$0xff] }
 0x322   : >> { %1025 = vst [vmem:[%s1739_s23 + $0x1d0] sm:$0xff] %v1024_v57  ;;  %1027 = vst [vmem:[%s1739_s23 + $0x1d8] sm:$0xff] %v1026_v58  ;;  %v1030_v60 = vld [vmem:[%s1743_s24 + $0x1e8] sm:$0xff]  ;;  %v1032_v61 = vld [vmem:[%s1743_s24 + $0x1f0] sm:$0xff] }
 0x323   : >> { %1029 = vst [vmem:[%s1739_s23 + $0x1e0] sm:$0xff] %v1028_v59  ;;  %1031 = vst [vmem:[%s1739_s23 + $0x1e8] sm:$0xff] %v1030_v60  ;;  %v1034_v62 = vld [vmem:[%s1743_s24 + $0x1f8] sm:$0xff]  ;;  %s2416_s24 = smov %s2067_s29 }
 0x324   : >> { %1033 = vst [vmem:[%s1739_s23 + $0x1f0] sm:$0xff] %v1032_v61  ;;  %1035 = vst [vmem:[%s1739_s23 + $0x1f8] sm:$0xff] %v1034_v62  ;;  %s2415_s23 = smov %s2070_s30 }
 0x325 PF: > { %s2176_s10 = sand.u32 63, %s895_s19   ;;  %s1450_s13 = sshll.u32 %s2000_s22, 13 }
 0x326   : > { %s1047_s16 = sshra.s32 %s1450_s13, 4  ;;  %p1433_p2 = scmp.le.s32.totalorder %s2176_s10, 0 }
 0x327   : > { %s1048_s11 = scalar_lea.vmem %s1976_s8, %s1047_s16 [#allocation3]   ;;  %s1051_s21 = scalar_lea.vmem %s1986_s20, %s1047_s16  }
 0x328   : > { %1345 = sbr.rel (%p1433_p2) target bundleno = 821 (0x335), region = 175  ;;  %s1753_s28 = smov (!%p1433_p2), %s1051_s21  }
 0x329   : > { %s1757_s27 = smov (!%p1433_p2), %s1048_s11   ;;  %s1761_s29 = smov (!%p1433_p2), 0  }
 0x32a   : > { %s1765_s26 = smov (!%p1433_p2), 0  }
 0x32d LB: >> { %v1063_v63 = vld [vmem:[%s1759_s27] sm:$0xff]  ;;  %s1065_s19 = sadd.s32 1, %s1763_s29  ;;  %s1057_s26 = sadd.s32 1, %s1767_s26   ;;  %s1767_s26 = sphi %s1765_s26, %s1057_s26   ;;  %s1763_s29 = sphi %s1761_s29, %s1762_s29   ;;  %s1759_s27 = sphi %s1757_s27, %s1070_s27   ;;  %s1755_s28 = sphi %s1753_s28, %s1071_s28  }
 0x32e   : >> { %1064 = vst [vmem:[%s1755_s28] sm:$0xff] %v1063_v63  ;;  %p1066_p3 = scmp.ge.s32.totalorder %s1065_s19, %s2176_s10  ;;  %p1056_p4 = scmp.ge.s32.totalorder %s1057_s26, %s2176_s10 }
 0x330   : >> { %s2433_s19 = smov (%p1066_p3, %s1065_s19), 0  ;;  %1059 = sbr.rel (!%p1056_p4) target bundleno = 813 (0x32d), region = 181 }
 0x331   : >> { %s1434_s22 = sshll.u32 %s2433_s19, 3  ;;  %s1762_s29 = smov %s2433_s19  }
 0x332   : >> { %s1070_s27 = scalar_lea.vmem %s1048_s11, %s1434_s22 [#allocation3]   ;;  %s1071_s28 = scalar_lea.vmem %s1051_s21, %s1434_s22  }
 0x335 PF: > { %1074 = sbr.rel (%p891_p11) target bundleno = 885 (0x375), region = 101  ;;  %s2188_s23 = ssub.s32 (!%p891_p11), %s2429_s15, %s1993_s18 }
 0x336   : > { %s1080_s24 = sshrl.u32 (!%p891_p11), %s2429_s15, 3 }
 0x337   : > { %s2197_s13 = sshrl.u32 (!%p891_p11), %s1080_s24, 6 }
 0x338   : > { %p1436_p5 = scmp.le.s32.totalorder (!%p891_p11), %s2197_s13, 0 }
 0x33a   : > { %1359 = sbr.rel (%p1436_p5) target bundleno = 864 (0x360), region = 186  ;;  %s2418_s10 = smov (!%p1436_p5), %s1986_s20 }
 0x33b   : > { %s2419_s16 = smov (!%p1436_p5), %s1976_s8  ;;  %s2206_s11 = smov (!%p1436_p5), 0  }
 0x33c   : > { %s2208_s21 = smov (!%p1436_p5), 0  }
 0x33f LB: >> { %v1093_v0 = vld [vmem:[%s1775_s16] sm:$0xff]  ;;  %v1095_v2 = vld [vmem:[%s1775_s16 + $0x8] sm:$0xff]  ;;  %v1097_v3 = vld [vmem:[%s1775_s16 + $0x10] sm:$0xff]  ;;  %s1221_s28 = sadd.s32 1, %s1779_s11  ;;  %s1087_s21 = sadd.s32 1, %s1783_s21   ;;  %s1783_s21 = sphi %s2208_s21, %s1087_s21   ;;  %s1779_s11 = sphi %s2206_s11, %s2422_s11   ;;  %s1775_s16 = sphi %s2419_s16, %s2421_s16   ;;  %s1771_s10 = sphi %s2418_s10, %s2420_s10  }
 0x340   : >> { %1094 = vst [vmem:[%s1771_s10] sm:$0xff] %v1093_v0  ;;  %1096 = vst [vmem:[%s1771_s10 + $0x8] sm:$0xff] %v1095_v2  ;;  %v1099_v4 = vld [vmem:[%s1775_s16 + $0x18] sm:$0xff]  ;;  %v1101_v5 = vld [vmem:[%s1775_s16 + $0x20] sm:$0xff]  ;;  %p1222_p6 = scmp.ge.s32.totalorder %s1221_s28, %s2197_s13  ;;  %p1086_p7 = scmp.ge.s32.totalorder %s1087_s21, %s2197_s13 }
 0x341   : >> { %1098 = vst [vmem:[%s1771_s10 + $0x10] sm:$0xff] %v1097_v3  ;;  %v1103_v6 = vld [vmem:[%s1775_s16 + $0x28] sm:$0xff]  ;;  %1100 = vst [vmem:[%s1771_s10 + $0x18] sm:$0xff] %v1099_v4  ;;  %v1105_v7 = vld [vmem:[%s1775_s16 + $0x30] sm:$0xff] }
 0x342   : >> { %1102 = vst [vmem:[%s1771_s10 + $0x20] sm:$0xff] %v1101_v5  ;;  %1104 = vst [vmem:[%s1771_s10 + $0x28] sm:$0xff] %v1103_v6  ;;  %v1107_v8 = vld [vmem:[%s1775_s16 + $0x38] sm:$0xff]  ;;  %v1109_v9 = vld [vmem:[%s1775_s16 + $0x40] sm:$0xff]  ;;  %s2435_s28 = smov (%p1222_p6, %s1221_s28), 0 }
 0x343   : >> { %1106 = vst [vmem:[%s1771_s10 + $0x30] sm:$0xff] %v1105_v7  ;;  %1108 = vst [vmem:[%s1771_s10 + $0x38] sm:$0xff] %v1107_v8  ;;  %v1111_v10 = vld [vmem:[%s1775_s16 + $0x48] sm:$0xff]  ;;  %v1113_v11 = vld [vmem:[%s1775_s16 + $0x50] sm:$0xff]  ;;  %s1437_s27 = sshll.u32 %s2435_s28, 9  ;;  %s2422_s11 = smov %s2435_s28 }
 0x344   : >> { %1110 = vst [vmem:[%s1771_s10 + $0x40] sm:$0xff] %v1109_v9  ;;  %v1115_v12 = vld [vmem:[%s1775_s16 + $0x58] sm:$0xff]  ;;  %1112 = vst [vmem:[%s1771_s10 + $0x48] sm:$0xff] %v1111_v10  ;;  %v1117_v13 = vld [vmem:[%s1775_s16 + $0x60] sm:$0xff]  ;;  %s2264_s29 = scalar_lea.vmem %s1976_s8, %s1437_s27 [#allocation3]   ;;  %s2267_s26 = scalar_lea.vmem %s1986_s20, %s1437_s27  }
 0x345   : >> { %1114 = vst [vmem:[%s1771_s10 + $0x50] sm:$0xff] %v1113_v11  ;;  %1116 = vst [vmem:[%s1771_s10 + $0x58] sm:$0xff] %v1115_v12  ;;  %v1119_v14 = vld [vmem:[%s1775_s16 + $0x68] sm:$0xff]  ;;  %v1121_v15 = vld [vmem:[%s1775_s16 + $0x70] sm:$0xff] }
 0x346   : >> { %1118 = vst [vmem:[%s1771_s10 + $0x60] sm:$0xff] %v1117_v13  ;;  %1120 = vst [vmem:[%s1771_s10 + $0x68] sm:$0xff] %v1119_v14  ;;  %v1123_v16 = vld [vmem:[%s1775_s16 + $0x78] sm:$0xff]  ;;  %v1125_v17 = vld [vmem:[%s1775_s16 + $0x80] sm:$0xff] }
 0x347   : >> { %1122 = vst [vmem:[%s1771_s10 + $0x70] sm:$0xff] %v1121_v15  ;;  %v1127_v18 = vld [vmem:[%s1775_s16 + $0x88] sm:$0xff]  ;;  %1124 = vst [vmem:[%s1771_s10 + $0x78] sm:$0xff] %v1123_v16  ;;  %v1129_v19 = vld [vmem:[%s1775_s16 + $0x90] sm:$0xff] }
 0x348   : >> { %1126 = vst [vmem:[%s1771_s10 + $0x80] sm:$0xff] %v1125_v17  ;;  %1128 = vst [vmem:[%s1771_s10 + $0x88] sm:$0xff] %v1127_v18  ;;  %v1131_v20 = vld [vmem:[%s1775_s16 + $0x98] sm:$0xff]  ;;  %v1133_v21 = vld [vmem:[%s1775_s16 + $0xa0] sm:$0xff] }
 0x349   : >> { %1130 = vst [vmem:[%s1771_s10 + $0x90] sm:$0xff] %v1129_v19  ;;  %1132 = vst [vmem:[%s1771_s10 + $0x98] sm:$0xff] %v1131_v20  ;;  %v1135_v22 = vld [vmem:[%s1775_s16 + $0xa8] sm:$0xff]  ;;  %v1137_v23 = vld [vmem:[%s1775_s16 + $0xb0] sm:$0xff] }
 0x34a   : >> { %1134 = vst [vmem:[%s1771_s10 + $0xa0] sm:$0xff] %v1133_v21  ;;  %v1139_v24 = vld [vmem:[%s1775_s16 + $0xb8] sm:$0xff]  ;;  %1136 = vst [vmem:[%s1771_s10 + $0xa8] sm:$0xff] %v1135_v22  ;;  %v1141_v25 = vld [vmem:[%s1775_s16 + $0xc0] sm:$0xff] }
 0x34b   : >> { %1138 = vst [vmem:[%s1771_s10 + $0xb0] sm:$0xff] %v1137_v23  ;;  %1140 = vst [vmem:[%s1771_s10 + $0xb8] sm:$0xff] %v1139_v24  ;;  %v1143_v26 = vld [vmem:[%s1775_s16 + $0xc8] sm:$0xff]  ;;  %v1145_v27 = vld [vmem:[%s1775_s16 + $0xd0] sm:$0xff] }
 0x34c   : >> { %1142 = vst [vmem:[%s1771_s10 + $0xc0] sm:$0xff] %v1141_v25  ;;  %1144 = vst [vmem:[%s1771_s10 + $0xc8] sm:$0xff] %v1143_v26  ;;  %v1147_v28 = vld [vmem:[%s1775_s16 + $0xd8] sm:$0xff]  ;;  %v1149_v29 = vld [vmem:[%s1775_s16 + $0xe0] sm:$0xff] }
 0x34d   : >> { %1146 = vst [vmem:[%s1771_s10 + $0xd0] sm:$0xff] %v1145_v27  ;;  %v1151_v30 = vld [vmem:[%s1775_s16 + $0xe8] sm:$0xff]  ;;  %1148 = vst [vmem:[%s1771_s10 + $0xd8] sm:$0xff] %v1147_v28  ;;  %v1153_v31 = vld [vmem:[%s1775_s16 + $0xf0] sm:$0xff] }
 0x34e   : >> { %1150 = vst [vmem:[%s1771_s10 + $0xe0] sm:$0xff] %v1149_v29  ;;  %1152 = vst [vmem:[%s1771_s10 + $0xe8] sm:$0xff] %v1151_v30  ;;  %v1155_v1 = vld [vmem:[%s1775_s16 + $0xf8] sm:$0xff]  ;;  %v1157_v32 = vld [vmem:[%s1775_s16 + $0x100] sm:$0xff] }
 0x34f   : >> { %1154 = vst [vmem:[%s1771_s10 + $0xf0] sm:$0xff] %v1153_v31  ;;  %1156 = vst [vmem:[%s1771_s10 + $0xf8] sm:$0xff] %v1155_v1  ;;  %v1159_v33 = vld [vmem:[%s1775_s16 + $0x108] sm:$0xff]  ;;  %v1161_v34 = vld [vmem:[%s1775_s16 + $0x110] sm:$0xff] }
 0x350   : >> { %1158 = vst [vmem:[%s1771_s10 + $0x100] sm:$0xff] %v1157_v32  ;;  %v1163_v35 = vld [vmem:[%s1775_s16 + $0x118] sm:$0xff]  ;;  %1160 = vst [vmem:[%s1771_s10 + $0x108] sm:$0xff] %v1159_v33  ;;  %v1165_v36 = vld [vmem:[%s1775_s16 + $0x120] sm:$0xff] }
 0x351   : >> { %1162 = vst [vmem:[%s1771_s10 + $0x110] sm:$0xff] %v1161_v34  ;;  %1164 = vst [vmem:[%s1771_s10 + $0x118] sm:$0xff] %v1163_v35  ;;  %v1167_v37 = vld [vmem:[%s1775_s16 + $0x128] sm:$0xff]  ;;  %v1169_v38 = vld [vmem:[%s1775_s16 + $0x130] sm:$0xff] }
 0x352   : >> { %1166 = vst [vmem:[%s1771_s10 + $0x120] sm:$0xff] %v1165_v36  ;;  %1168 = vst [vmem:[%s1771_s10 + $0x128] sm:$0xff] %v1167_v37  ;;  %v1171_v39 = vld [vmem:[%s1775_s16 + $0x138] sm:$0xff]  ;;  %v1173_v40 = vld [vmem:[%s1775_s16 + $0x140] sm:$0xff] }
 0x353   : >> { %1170 = vst [vmem:[%s1771_s10 + $0x130] sm:$0xff] %v1169_v38  ;;  %v1175_v41 = vld [vmem:[%s1775_s16 + $0x148] sm:$0xff]  ;;  %1172 = vst [vmem:[%s1771_s10 + $0x138] sm:$0xff] %v1171_v39  ;;  %v1177_v42 = vld [vmem:[%s1775_s16 + $0x150] sm:$0xff] }
 0x354   : >> { %1174 = vst [vmem:[%s1771_s10 + $0x140] sm:$0xff] %v1173_v40  ;;  %1176 = vst [vmem:[%s1771_s10 + $0x148] sm:$0xff] %v1175_v41  ;;  %v1179_v43 = vld [vmem:[%s1775_s16 + $0x158] sm:$0xff]  ;;  %v1181_v44 = vld [vmem:[%s1775_s16 + $0x160] sm:$0xff] }
 0x355   : >> { %1178 = vst [vmem:[%s1771_s10 + $0x150] sm:$0xff] %v1177_v42  ;;  %1180 = vst [vmem:[%s1771_s10 + $0x158] sm:$0xff] %v1179_v43  ;;  %v1183_v45 = vld [vmem:[%s1775_s16 + $0x168] sm:$0xff]  ;;  %v1185_v46 = vld [vmem:[%s1775_s16 + $0x170] sm:$0xff] }
 0x356   : >> { %1182 = vst [vmem:[%s1771_s10 + $0x160] sm:$0xff] %v1181_v44  ;;  %v1187_v47 = vld [vmem:[%s1775_s16 + $0x178] sm:$0xff]  ;;  %1184 = vst [vmem:[%s1771_s10 + $0x168] sm:$0xff] %v1183_v45  ;;  %v1189_v48 = vld [vmem:[%s1775_s16 + $0x180] sm:$0xff] }
 0x357   : >> { %1186 = vst [vmem:[%s1771_s10 + $0x170] sm:$0xff] %v1185_v46  ;;  %1188 = vst [vmem:[%s1771_s10 + $0x178] sm:$0xff] %v1187_v47  ;;  %v1191_v49 = vld [vmem:[%s1775_s16 + $0x188] sm:$0xff]  ;;  %v1193_v50 = vld [vmem:[%s1775_s16 + $0x190] sm:$0xff] }
 0x358   : >> { %1190 = vst [vmem:[%s1771_s10 + $0x180] sm:$0xff] %v1189_v48  ;;  %1192 = vst [vmem:[%s1771_s10 + $0x188] sm:$0xff] %v1191_v49  ;;  %v1195_v51 = vld [vmem:[%s1775_s16 + $0x198] sm:$0xff]  ;;  %v1197_v52 = vld [vmem:[%s1775_s16 + $0x1a0] sm:$0xff] }
 0x359   : >> { %1194 = vst [vmem:[%s1771_s10 + $0x190] sm:$0xff] %v1193_v50  ;;  %v1199_v53 = vld [vmem:[%s1775_s16 + $0x1a8] sm:$0xff]  ;;  %1196 = vst [vmem:[%s1771_s10 + $0x198] sm:$0xff] %v1195_v51  ;;  %v1201_v54 = vld [vmem:[%s1775_s16 + $0x1b0] sm:$0xff] }
 0x35a   : >> { %1198 = vst [vmem:[%s1771_s10 + $0x1a0] sm:$0xff] %v1197_v52  ;;  %1200 = vst [vmem:[%s1771_s10 + $0x1a8] sm:$0xff] %v1199_v53  ;;  %v1203_v55 = vld [vmem:[%s1775_s16 + $0x1b8] sm:$0xff]  ;;  %v1205_v56 = vld [vmem:[%s1775_s16 + $0x1c0] sm:$0xff] }
 0x35b   : >> { %1202 = vst [vmem:[%s1771_s10 + $0x1b0] sm:$0xff] %v1201_v54  ;;  %1204 = vst [vmem:[%s1771_s10 + $0x1b8] sm:$0xff] %v1203_v55  ;;  %v1207_v57 = vld [vmem:[%s1775_s16 + $0x1c8] sm:$0xff]  ;;  %v1209_v58 = vld [vmem:[%s1775_s16 + $0x1d0] sm:$0xff]  ;;  %1089 = sbr.rel (!%p1086_p7) target bundleno = 831 (0x33f), region = 192 }
 0x35c   : >> { %1206 = vst [vmem:[%s1771_s10 + $0x1c0] sm:$0xff] %v1205_v56  ;;  %v1211_v59 = vld [vmem:[%s1775_s16 + $0x1d8] sm:$0xff]  ;;  %1208 = vst [vmem:[%s1771_s10 + $0x1c8] sm:$0xff] %v1207_v57  ;;  %v1213_v60 = vld [vmem:[%s1775_s16 + $0x1e0] sm:$0xff] }
 0x35d   : >> { %1210 = vst [vmem:[%s1771_s10 + $0x1d0] sm:$0xff] %v1209_v58  ;;  %1212 = vst [vmem:[%s1771_s10 + $0x1d8] sm:$0xff] %v1211_v59  ;;  %v1215_v61 = vld [vmem:[%s1775_s16 + $0x1e8] sm:$0xff]  ;;  %v1217_v62 = vld [vmem:[%s1775_s16 + $0x1f0] sm:$0xff] }
 0x35e   : >> { %1214 = vst [vmem:[%s1771_s10 + $0x1e0] sm:$0xff] %v1213_v60  ;;  %1216 = vst [vmem:[%s1771_s10 + $0x1e8] sm:$0xff] %v1215_v61  ;;  %v1219_v63 = vld [vmem:[%s1775_s16 + $0x1f8] sm:$0xff]  ;;  %s2421_s16 = smov %s2264_s29 }
 0x35f   : >> { %1218 = vst [vmem:[%s1771_s10 + $0x1f0] sm:$0xff] %v1217_v62  ;;  %1220 = vst [vmem:[%s1771_s10 + $0x1f8] sm:$0xff] %v1219_v63  ;;  %s2420_s10 = smov %s2267_s26 }
 0x360 PF: > { %s2373_s19 = sand.u32 63, %s1080_s24   ;;  %s1452_s22 = sshll.u32 %s2197_s13, 13 }
 0x361   : > { %s1232_s27 = sshra.s32 %s1452_s22, 4  ;;  %p1442_p8 = scmp.le.s32.totalorder %s2373_s19, 0 }
 0x362   : > { %s1233_s30 = scalar_lea.vmem %s1976_s8, %s1232_s27 [#allocation3]   ;;  %s1236_s25 = scalar_lea.vmem %s1986_s20, %s1232_s27  }
 0x363   : > { %1373 = sbr.rel (%p1442_p8) target bundleno = 880 (0x370), region = 197  ;;  %s1785_s29 = smov (!%p1442_p8), %s1236_s25  }
 0x364   : > { %s1789_s28 = smov (!%p1442_p8), %s1233_s30   ;;  %s1793_s26 = smov (!%p1442_p8), 0  }
 0x365   : > { %s1797_s21 = smov (!%p1442_p8), 0  }
 0x368 LB: >> { %v1248_v0 = vld [vmem:[%s1791_s28] sm:$0xff]  ;;  %s1250_s24 = sadd.s32 1, %s1795_s26  ;;  %s1242_s21 = sadd.s32 1, %s1799_s21   ;;  %s1799_s21 = sphi %s1797_s21, %s1242_s21   ;;  %s1795_s26 = sphi %s1793_s26, %s1794_s26   ;;  %s1791_s28 = sphi %s1789_s28, %s1255_s28   ;;  %s1787_s29 = sphi %s1785_s29, %s1256_s29  }
 0x369   : >> { %1249 = vst [vmem:[%s1787_s29] sm:$0xff] %v1248_v0  ;;  %p1251_p9 = scmp.ge.s32.totalorder %s1250_s24, %s2373_s19  ;;  %p1241_p10 = scmp.ge.s32.totalorder %s1242_s21, %s2373_s19 }
 0x36b   : >> { %s2437_s24 = smov (%p1251_p9, %s1250_s24), 0  ;;  %1244 = sbr.rel (!%p1241_p10) target bundleno = 872 (0x368), region = 203 }
 0x36c   : >> { %s1443_s13 = sshll.u32 %s2437_s24, 3  ;;  %s1794_s26 = smov %s2437_s24  }
 0x36d   : >> { %s1255_s28 = scalar_lea.vmem %s1233_s30, %s1443_s13 [#allocation3]   ;;  %s1256_s29 = scalar_lea.vmem %s1236_s25, %s1443_s13  }
 0x370 PF: > { %s1804_s10 = smov 1   ;;  %s2423_s22 = scalar_lea.vmem %s1976_s8, %s2188_s23 [#allocation3] }
 0x371   : > { %s1257_s16 = sshll.u32 %s1804_s10, %s1993_s18  ;;  %s2424_s27 = scalar_lea.vmem %s1986_s20, %s2188_s23 }
 0x372   : > { %s1445_s11 = sadd.s32 4294967295, %s1257_s16 }
 0x373   : > { %v1267_v2 = vld [vmem:[%s2423_s22] sm:%s1445_s11] }
 0x374   : > { %1268 = vst [vmem:[%s2424_s27] sm:%s1445_s11] %v1267_v2 }
 0x375 PF: > { %p1446_p11 = scmp.ge.u32.totalorder %s2429_s15, 8 }
 0x376   : > { %s1805_s29 = smov (!%p1446_p11), 1  }
 0x377   : > { %877 = sbr.rel (%p1446_p11) target bundleno = 894 (0x37e), region = 72  ;;  %s878_s25 = sshll.u32 (!%p1446_p11), %s1805_s29, %s2429_s15 }
 0x378   : > { %s1447_s30 = sadd.s32 (!%p1446_p11), 4294967295, %s878_s25 }
 0x37c   : > { %v888_v3 = vld [vmem:[%s1976_s8] sm:%s1447_s30] }
 0x37d   : > { %889 = vst [vmem:[%s1986_s20] sm:%s1447_s30] %v888_v3 }
 0x37e PF: > { %p18_p12 = scmp.ge.s32.totalorder %s1872_s14, 4   ;;  %s2425_s11 = smov %s1731_s12 }
 0x37f   : > { %s2426_s12 = smov %s1879_s17  ;;  %s2427_s13 = smov %s1872_s14 }
 0x380   :  { %20 = sbr.rel (!%p18_p12) target bundleno = 5 (0x5), region = 214 }

</bundles_post_ra>
